<compile_context>
chip_gen: v7x
topology: tpu7x:2x2x1
jax: 0.10.0
libtpu: 0.0.40
codegen_flags: <defaults>
</compile_context>

<pallas_src>
import functools

import jax
import jax.numpy as jnp
from jax import lax
from jax.experimental import pallas as pl
from jax.experimental.pallas import tpu as pltpu


def _seq_tile(s, candidates):
    """Largest MXU-friendly tile that divides s; else the full extent
    (block == full dim is always a legal BlockSpec)."""
    for t in candidates:
        if s >= t and s % t == 0:
            return t
    return s


# --------------------------------------------------------------------------- #
# Kernel 1: fused QKV projection                                              #
# --------------------------------------------------------------------------- #
def qkv_proj_kernel(x_ref, w_ref, b_ref, q_ref, k_ref, v_ref, *, hidden):
    # x arrives as f32; cast to bf16 on the VPU (cheaper than a wrapper-side
    # cast that round-trips x through HBM).
    x = x_ref[0].astype(w_ref.dtype)               # (ts, H) bf16
    # One MXU pass with N = 3H instead of three N = H passes.
    qkv = jnp.dot(x, w_ref[...],
                  preferred_element_type=jnp.float32) + b_ref[...]
    qkv = qkv.astype(q_ref.dtype)
    q_ref[0] = qkv[:, :hidden]
    k_ref[0] = qkv[:, hidden:2 * hidden]
    v_ref[0] = qkv[:, 2 * hidden:]


# --------------------------------------------------------------------------- #
# Kernel 2: flash attention + output projection                               #
# --------------------------------------------------------------------------- #
def flash_attn_kernel(q_ref, k_ref, v_ref, wo_ref, bo_ref, o_ref,
                      m_sc, l_sc, acc_sc, ctx_sc, *, num_heads, head_dim):
    ki = pl.program_id(2)

    @pl.when(ki == 0)
    def _init():
        m_sc[...] = jnp.full_like(m_sc, -jnp.inf)
        l_sc[...] = jnp.zeros_like(l_sc)
        acc_sc[...] = jnp.zeros_like(acc_sc)

    q = q_ref[0]                                   # (tq, H) bf16 (pre-scaled)
    k = k_ref[0]                                   # (tk, H) bf16
    v = v_ref[0]                                   # (tk, H) bf16

    # Per-head lane slices (static offsets) instead of split-head transposes.
    for h in range(num_heads):
        lo = h * head_dim
        q_h = q[:, lo:lo + head_dim]               # (tq, hd)
        k_h = k[:, lo:lo + head_dim]               # (tk, hd)
        v_h = v[:, lo:lo + head_dim]               # (tk, hd)

        # Scores on the MXU: bf16 operands, f32 accumulation; K "transpose"
        # expressed via contraction dims (no XLU transpose op).  The softmax
        # scale is already folded into the Q projection weights.
        s = lax.dot_general(q_h, k_h, (((1,), (1,)), ((), ())),
                            preferred_element_type=jnp.float32)

        # Online softmax (strictly f32 math).
        m_prev = m_sc[h]                           # (tq, 1)
        m_new = jnp.maximum(m_prev, jnp.max(s, axis=-1, keepdims=True))
        alpha = jnp.exp(m_prev - m_new)
        p = jnp.exp(s - m_new)                     # (tq, tk) f32
        l_sc[h] = alpha * l_sc[h] + jnp.sum(p, axis=-1, keepdims=True)
        acc_sc[h] = alpha * acc_sc[h] + jnp.dot(
            p.astype(v_h.dtype), v_h, preferred_element_type=jnp.float32)
        m_sc[h] = m_new

    @pl.when(ki == pl.num_programs(2) - 1)
    def _finalize():
        # Normalize each head into one (tq, H) bf16 scratch (heads are
        # contiguous lane slices -> straight stores), then a SINGLE K=H
        # output-projection matmul instead of num_heads K=head_dim matmuls.
        for h in range(num_heads):
            inv_l = pl.reciprocal(l_sc[h], approx=True)          # EUP slot
            lo = h * head_dim
            ctx_sc[:, lo:lo + head_dim] = (acc_sc[h] * inv_l).astype(
                ctx_sc.dtype)
        out = jnp.dot(ctx_sc[...], wo_ref[...],
                      preferred_element_type=jnp.float32)
        o_ref[0] = (out + bo_ref[...]).astype(o_ref.dtype)


# --------------------------------------------------------------------------- #
# Wrappers                                                                    #
# --------------------------------------------------------------------------- #
def prepare_params(params, num_heads, compute_dtype=jnp.bfloat16):
    """One-time packing of PyTorch-layout Linear params.

    PyTorch Linear stores W as (out, in); transpose to (in, out) ONCE so the
    kernels compute y = x @ W + b.  Q/K/V are fused into a single (H, 3H)
    weight, the 1/sqrt(head_dim) softmax scale is folded into the Q weight and
    bias, and all matmul weights live in HBM as bf16.
    """
    H = params["wq"].shape[0]
    head_dim = H // num_heads
    scale = 1.0 / float(head_dim) ** 0.5
    w_qkv = jnp.concatenate(
        [params["wq"].T * scale, params["wk"].T, params["wv"].T],
        axis=1)                                                      # (H, 3H)
    b_qkv = jnp.concatenate(
        [params["bq"] * scale, params["bk"], params["bv"]], axis=0)  # (3H,)
    return {
        "w_qkv": w_qkv.astype(compute_dtype),
        "b_qkv": b_qkv.reshape(1, -1).astype(jnp.float32),
        "wo": params["wo"].T.astype(compute_dtype),                  # (H, H)
        "bo": params["bo"].reshape(1, -1).astype(jnp.float32),
    }


def multi_head_attention(x, prepared, *, num_heads,
                         compute_dtype=jnp.bfloat16,
                         out_dtype=None,
                         ts=None, tq=None, tk=None,
                         vmem_limit_bytes=48 * 1024 * 1024):
    """x: (B, S, H) float32. prepared: output of prepare_params()."""
    B, S, H = x.shape
    head_dim = H // num_heads
    out_dtype = x.dtype if out_dtype is None else out_dtype

    # Projection tile, query tile (large to cut K/V re-reads), kv tile.
    ts = ts if ts is not None else _seq_tile(S, (1024, 512, 256, 128))
    tq = tq if tq is not None else _seq_tile(S, (2048, 1024, 512, 256, 128))
    tk = tk if tk is not None else _seq_tile(S, (512, 256, 128))

    # ---- kernel 1: fused QKV projection ------------------------------------
    q, k, v = pl.pallas_call(
        functools.partial(qkv_proj_kernel, hidden=H),
        out_shape=(
            jax.ShapeDtypeStruct((B, S, H), compute_dtype),
            jax.ShapeDtypeStruct((B, S, H), compute_dtype),
            jax.ShapeDtypeStruct((B, S, H), compute_dtype),
        ),
        grid_spec=pltpu.PrefetchScalarGridSpec(
            num_scalar_prefetch=0,
            grid=(B, S // ts),
            in_specs=[
                pl.BlockSpec((1, ts, H), lambda b, si: (b, si, 0)),      # x f32
                pl.BlockSpec((H, 3 * H), lambda b, si: (0, 0)),          # W_qkv
                pl.BlockSpec((1, 3 * H), lambda b, si: (0, 0)),          # b_qkv
            ],
            out_specs=[
                pl.BlockSpec((1, ts, H), lambda b, si: (b, si, 0)),
                pl.BlockSpec((1, ts, H), lambda b, si: (b, si, 0)),
                pl.BlockSpec((1, ts, H), lambda b, si: (b, si, 0)),
            ],
        ),
        compiler_params=pltpu.CompilerParams(
            dimension_semantics=("parallel", "parallel"),
            vmem_limit_bytes=vmem_limit_bytes),
    )(x, prepared["w_qkv"], prepared["b_qkv"])

    # ---- kernel 2: flash attention + output projection ---------------------
    out = pl.pallas_call(
        functools.partial(flash_attn_kernel, num_heads=num_heads,
                          head_dim=head_dim),
        out_shape=jax.ShapeDtypeStruct((B, S, H), out_dtype),
        grid_spec=pltpu.PrefetchScalarGridSpec(
            num_scalar_prefetch=0,
            grid=(B, S // tq, S // tk),
            in_specs=[
                pl.BlockSpec((1, tq, H), lambda b, qi, ki: (b, qi, 0)),  # q
                pl.BlockSpec((1, tk, H), lambda b, qi, ki: (b, ki, 0)),  # k
                pl.BlockSpec((1, tk, H), lambda b, qi, ki: (b, ki, 0)),  # v
                pl.BlockSpec((H, H), lambda b, qi, ki: (0, 0)),          # Wo
                pl.BlockSpec((1, H), lambda b, qi, ki: (0, 0)),          # bo
            ],
            out_specs=pl.BlockSpec((1, tq, H), lambda b, qi, ki: (b, qi, 0)),
            scratch_shapes=[
                pltpu.VMEM((num_heads, tq, 1), jnp.float32),         # m
                pltpu.VMEM((num_heads, tq, 1), jnp.float32),         # l
                pltpu.VMEM((num_heads, tq, head_dim), jnp.float32),  # acc
                pltpu.VMEM((tq, H), compute_dtype),                  # ctx
            ],
        ),
        compiler_params=pltpu.CompilerParams(
            dimension_semantics=("parallel", "parallel", "arbitrary"),
            vmem_limit_bytes=vmem_limit_bytes),
    )(q, k, v, prepared["wo"], prepared["bo"])
    return out


# --------------------------------------------------------------------------- #
# Plain-JAX reference (eval-mode PyTorch forward, f32)                        #
# --------------------------------------------------------------------------- #
def reference_mha(x, params, *, num_heads):
    B, S, H = x.shape
    hd = H // num_heads

    def lin(t, w, b):
        return t @ w.T + b

    def split(t):
        return t.reshape(B, S, num_heads, hd).transpose(0, 2, 1, 3)

    q = split(lin(x, params["wq"], params["bq"]))
    k = split(lin(x, params["wk"], params["bk"]))
    v = split(lin(x, params["wv"], params["bv"]))
    scores = jnp.einsum('bhqd,bhkd->bhqk', q, k) / jnp.sqrt(jnp.float32(hd))
    attn = jax.nn.softmax(scores, axis=-1)
    ctx = jnp.einsum('bhqk,bhkd->bhqd', attn, v)
    ctx = ctx.transpose(0, 2, 1, 3).reshape(B, S, H)
    return lin(ctx, params["wo"], params["bo"])


def _make_params(key, H):
    keys = jax.random.split(key, 8)
    bound = 1.0 / float(H) ** 0.5   # PyTorch default Linear init range

    def u(k, shape):
        return jax.random.uniform(k, shape, jnp.float32, -bound, bound)

    return {
        "wq": u(keys[0], (H, H)), "bq": u(keys[1], (H,)),
        "wk": u(keys[2], (H, H)), "bk": u(keys[3], (H,)),
        "wv": u(keys[4], (H, H)), "bv": u(keys[5], (H,)),
        "wo": u(keys[6], (H, H)), "bo": u(keys[7], (H,)),
    }


if __name__ == "__main__":
    root = jax.random.PRNGKey(0)
    k_small, k_big = jax.random.split(root, 2)

    # ---- test 1: small config consistent with the module --------------------
    # hidden=32, heads=4, seq=8, batch=2.
    B, S, H, NUM_HEADS = 2, 8, 32, 4
    kp, kx = jax.random.split(k_small)
    params = _make_params(kp, H)
    x = jax.random.normal(kx, (B, S, H), jnp.float32)

    prepared = prepare_params(params, NUM_HEADS)    # one-time weight packing
    out = multi_head_attention(x, prepared, num_heads=NUM_HEADS)
    out = jax.block_until_ready(out)

    ref = reference_mha(x, params, num_heads=NUM_HEADS)
    assert out.shape == (B, S, H)
    max_err = float(jnp.max(jnp.abs(out - ref)))
    # bf16 MXU operands with f32 accumulation -> expect ~1e-2 abs error.
    assert jnp.allclose(out, ref, atol=5e-2, rtol=5e-2), (
        f"small-config mismatch vs reference (max abs err {max_err})")

    # ---- test 2: multi-tile grid / head_dim=64 path (review concern) -------
    B2, S2, H2, NH2 = 1, 512, 256, 4
    kp2, kx2 = jax.random.split(k_big)
    params2 = _make_params(kp2, H2)
    x2 = jax.random.normal(kx2, (B2, S2, H2), jnp.float32)

    prepared2 = prepare_params(params2, NH2)
    out2 = multi_head_attention(x2, prepared2, num_heads=NH2,
                                tq=256, tk=128)     # grid (1, 2, 4)
    out2 = jax.block_until_ready(out2)

    ref2 = reference_mha(x2, params2, num_heads=NH2)
    assert out2.shape == (B2, S2, H2)
    max_err2 = float(jnp.max(jnp.abs(out2 - ref2)))
    assert jnp.allclose(out2, ref2, atol=1e-1, rtol=5e-2), (
        f"tiled-config mismatch vs reference (max abs err {max_err2})")

    print("KERNEL_OK")
</pallas_src>

<mosaic_0001>
module attributes {stable_mosaic.version = 11 : i64} {
  func.func @qkv_proj_kernel(%arg0: i32, %arg1: i32, %arg2: memref<1x8x32xf32, #tpu.memory_space<vmem>>, %arg3: memref<32x96xbf16, #tpu.memory_space<vmem>>, %arg4: memref<1x96xf32, #tpu.memory_space<vmem>>, %arg5: memref<1x8x32xbf16, #tpu.memory_space<vmem>>, %arg6: memref<1x8x32xbf16, #tpu.memory_space<vmem>>, %arg7: memref<1x8x32xbf16, #tpu.memory_space<vmem>>) attributes {dimension_semantics = [#tpu.dimension_semantics<parallel>, #tpu.dimension_semantics<parallel>], iteration_bounds = array<i64: 2, 1>, scalar_prefetch = 0 : i64, scratch_operands = 0 : i64, tpu.core_type = #tpu.core_type<tc>, window_params = [{transform_indices = @transform_0, window_bounds = array<i64: 1, 8, 32>}, {pipeline_mode = #tpu.pipeline_mode<synchronous>, transform_indices = @transform_1, window_bounds = array<i64: 32, 96>}, {pipeline_mode = #tpu.pipeline_mode<synchronous>, transform_indices = @transform_2, window_bounds = array<i64: 1, 96>}, {transform_indices = @transform_3, window_bounds = array<i64: 1, 8, 32>}, {transform_indices = @transform_4, window_bounds = array<i64: 1, 8, 32>}, {transform_indices = @transform_5, window_bounds = array<i64: 1, 8, 32>}]} {
    %c0 = arith.constant 0 : index
    %c0_0 = arith.constant 0 : index
    %c0_1 = arith.constant 0 : index
    %0 = vector.load %arg2[%c0, %c0_0, %c0_1] : memref<1x8x32xf32, #tpu.memory_space<vmem>>, vector<1x8x32xf32>
    %1 = vector.shape_cast %0 : vector<1x8x32xf32> to vector<8x32xf32>
    %2 = arith.truncf %1 : vector<8x32xf32> to vector<8x32xbf16>
    %c0_2 = arith.constant 0 : index
    %c0_3 = arith.constant 0 : index
    %3 = vector.load %arg3[%c0_2, %c0_3] : memref<32x96xbf16, #tpu.memory_space<vmem>>, vector<32x96xbf16>
    %cst = arith.constant dense<0.000000e+00> : vector<8x96xf32>
    %4 = tpu.matmul %2, %3, %cst {dimension_numbers = #tpu.dot_dimension_numbers<[1], [0], [0], [1], [0, 0, 1, 1], [], []>} : vector<8x32xbf16>, vector<32x96xbf16>, vector<8x96xf32> -> vector<8x96xf32>
    %c0_4 = arith.constant 0 : index
    %c0_5 = arith.constant 0 : index
    %5 = vector.load %arg4[%c0_4, %c0_5] : memref<1x96xf32, #tpu.memory_space<vmem>>, vector<1x96xf32>
    %6 = vector.broadcast %5 : vector<1x96xf32> to vector<8x96xf32>
    %7 = arith.addf %4, %6 : vector<8x96xf32>
    %8 = arith.truncf %7 : vector<8x96xf32> to vector<8x96xbf16>
    %9 = vector.extract_strided_slice %8 {offsets = [0, 0], sizes = [8, 32], strides = [1, 1]} : vector<8x96xbf16> to vector<8x32xbf16>
    %c0_6 = arith.constant 0 : index
    %c0_7 = arith.constant 0 : index
    %c0_8 = arith.constant 0 : index
    %10 = vector.load %arg5[%c0_6, %c0_7, %c0_8] : memref<1x8x32xbf16, #tpu.memory_space<vmem>>, vector<1x8x32xbf16>
    %11 = vector.shape_cast %10 : vector<1x8x32xbf16> to vector<8x32xbf16>
    %12 = vector.shape_cast %9 : vector<8x32xbf16> to vector<1x8x32xbf16>
    tpu.vector_store %arg5[%c0_6, %c0_7, %c0_8], %12 {strides = array<i32>} : memref<1x8x32xbf16, #tpu.memory_space<vmem>>, vector<1x8x32xbf16>,
    %13 = vector.extract_strided_slice %8 {offsets = [0, 32], sizes = [8, 32], strides = [1, 1]} : vector<8x96xbf16> to vector<8x32xbf16>
    %c0_9 = arith.constant 0 : index
    %c0_10 = arith.constant 0 : index
    %c0_11 = arith.constant 0 : index
    %14 = vector.load %arg6[%c0_9, %c0_10, %c0_11] : memref<1x8x32xbf16, #tpu.memory_space<vmem>>, vector<1x8x32xbf16>
    %15 = vector.shape_cast %14 : vector<1x8x32xbf16> to vector<8x32xbf16>
    %16 = vector.shape_cast %13 : vector<8x32xbf16> to vector<1x8x32xbf16>
    tpu.vector_store %arg6[%c0_9, %c0_10, %c0_11], %16 {strides = array<i32>} : memref<1x8x32xbf16, #tpu.memory_space<vmem>>, vector<1x8x32xbf16>,
    %17 = vector.extract_strided_slice %8 {offsets = [0, 64], sizes = [8, 32], strides = [1, 1]} : vector<8x96xbf16> to vector<8x32xbf16>
    %c0_12 = arith.constant 0 : index
    %c0_13 = arith.constant 0 : index
    %c0_14 = arith.constant 0 : index
    %18 = vector.load %arg7[%c0_12, %c0_13, %c0_14] : memref<1x8x32xbf16, #tpu.memory_space<vmem>>, vector<1x8x32xbf16>
    %19 = vector.shape_cast %18 : vector<1x8x32xbf16> to vector<8x32xbf16>
    %20 = vector.shape_cast %17 : vector<8x32xbf16> to vector<1x8x32xbf16>
    tpu.vector_store %arg7[%c0_12, %c0_13, %c0_14], %20 {strides = array<i32>} : memref<1x8x32xbf16, #tpu.memory_space<vmem>>, vector<1x8x32xbf16>,
    return
  }
  func.func @transform_0(%arg0: i32, %arg1: i32) -> (i32, i32, i32) {
    %c0_i32 = arith.constant 0 : i32
    %c0_i32_0 = arith.constant 0 : i32
    return %arg0, %arg1, %c0_i32 : i32, i32, i32
  }
  func.func @transform_1(%arg0: i32, %arg1: i32) -> (i32, i32) {
    %c0_i32 = arith.constant 0 : i32
    %c0_i32_0 = arith.constant 0 : i32
    %c0_i32_1 = arith.constant 0 : i32
    return %c0_i32, %c0_i32_0 : i32, i32
  }
  func.func @transform_2(%arg0: i32, %arg1: i32) -> (i32, i32) {
    %c0_i32 = arith.constant 0 : i32
    %c0_i32_0 = arith.constant 0 : i32
    %c0_i32_1 = arith.constant 0 : i32
    return %c0_i32, %c0_i32_0 : i32, i32
  }
  func.func @transform_3(%arg0: i32, %arg1: i32) -> (i32, i32, i32) {
    %c0_i32 = arith.constant 0 : i32
    %c0_i32_0 = arith.constant 0 : i32
    return %arg0, %arg1, %c0_i32 : i32, i32, i32
  }
  func.func @transform_4(%arg0: i32, %arg1: i32) -> (i32, i32, i32) {
    %c0_i32 = arith.constant 0 : i32
    %c0_i32_0 = arith.constant 0 : i32
    return %arg0, %arg1, %c0_i32 : i32, i32, i32
  }
  func.func @transform_5(%arg0: i32, %arg1: i32) -> (i32, i32, i32) {
    %c0_i32 = arith.constant 0 : i32
    %c0_i32_0 = arith.constant 0 : i32
    return %arg0, %arg1, %c0_i32 : i32, i32, i32
  }
}

</mosaic_0001>

<bundles_post_ra>
// kernel: tpu_custom_call.1
= control target key start
LH: loop header
LB: loop body
LE: loop exit
PB: predicated region body
PF: predicated region fallthrough
CT: control target
= control target key end

     0   :  { %11 = vsyncpa [#allocation3], 0  ;;  %s1259_s0 = inlined_call_operand.hbm [shape: f32[2,8,32], index: 0, kind: input, shape index: {}]   ;;  %s1260_s1 = inlined_call_operand.hbm [shape: bf16[32,96], index: 1, kind: input, shape index: {}]   ;;  %s1261_s2 = inlined_call_operand.vmem [shape: f32[1,96], index: 2, kind: input, shape index: {}]   ;;  %s1262_s3 = inlined_call_operand.hbm [shape: bf16[2,8,32], index: 3, kind: output, shape index: {0}]   ;;  %s1263_s4 = inlined_call_operand.hbm [shape: bf16[2,8,32], index: 4, kind: output, shape index: {1}]   ;;  %s1264_s5 = inlined_call_operand.hbm [shape: bf16[2,8,32], index: 5, kind: output, shape index: {2}]  }
   0x1   :  { %13 = vsyncpa [#allocation3 + $0x1], 0 }
   0x2   :  { %14 = vsyncpa [#allocation6], 0 }
   0x3   :  { %15 = vsyncpa [#allocation4], 0 }
   0x4   :  { %17 = vsyncpa [#allocation4 + $0x1], 0 }
   0x5   :  { %18 = vsyncpa [#allocation9], 0 }
   0x6   :  { %20 = vsyncpa [#allocation9 + $0x1], 0  ;;  %s960_s18 = smov 0   ;;  %s962_s19 = smov 0  }
   0x7   :  { %s964_s20 = smov 0   ;;  %s966_s21 = smov 0  }
   0x8   :  { %s968_s22 = smov 0   ;;  %s970_s23 = smov 0  }
   0x9 LB: > { %s991_s24 = sadd.s32 4294967295, %s917_s23   ;;  %s1268_s25 = sadd.s32 4294967294, %s917_s23   ;;  %s917_s23 = sphi %s970_s23, %s26_s23   ;;  %s913_s22 = sphi %s968_s22, %s1288_s22   ;;  %s909_s21 = sphi %s966_s21, %s1287_s21   ;;  %s905_s20 = sphi %s964_s20, %s1286_s20   ;;  %s901_s19 = sphi %s962_s19, %s1285_s19   ;;  %s897_s18 = sphi %s960_s18, %s1284_s18  }
   0xa   : > { %p60_p0 = scmp.ne.s32.totalorder %s901_s19, %s897_s18  ;;  %p1265_p1 = scmp.eq.s32.totalorder %s991_s24, 0 }
   0xb   : > { %p134_p3 = scmp.eq.s32.totalorder %s1268_s25, 1  ;;  %p586_p5 = scmp.ge.s32.totalorder %s917_s23, 1 }
   0xc   : > { %p1002_p4 = por %p1265_p1, %p60_p0  ;;  %p197_p7 = scmp.lt.s32.totalorder %s917_s23, 3 }
   0xd   : > { %p1007_p6 = por %p134_p3, %p60_p0  ;;  %s919_s29 = smov [#allocation5]  }
   0xe   : > { %s1269_s26 = scalar_select %p1002_p4, 1, 0 }
   0xf   : > { %s1270_s27 = scalar_select %p1007_p6, 1, 0 }
  0x10   : > { %p1012_p8 = pnand %p586_p5, %p197_p7  ;;  %s209_s30 = sshll.u32 %s919_s29, 4  ;;  %s210_s30 = int_to_ptr.vmem [resolvable:$true] %s209_s30 }
  0x11   : > { %s38_s7 = sadd.s32 1, %s913_s22  ;;  %s713_s10 = scalar_lea.hbm %s1260_s1, 256 }
  0x12   : > { %s1271_s28 = scalar_select %p1012_p8, 1, 0 }
  0x13   : > { %p634_p9 = pneg %p1012_p8  ;;  %p714_p12 = scmp.ne.s32.totalorder %s1260_s1, %s713_s10 }
  0x14   : > { %p720_p5 = scmp.lt.u32.totalorder %s713_s10, %s1260_s1 }
  0x15   : > { %p1021_p11 = pnand %p634_p9, %p1265_p1 }
  0x17   : > { %p715_p13 = pneg %p1021_p11 }
  0x19   : > { %p716_p0 = pnand %p715_p13, %p714_p12 }
  0x1b   : > { %p717_p3 = pneg %p716_p0 }
  0x1d   : > { %p722_p7 = pnand %p720_p5, %p717_p3 }
  0x1f   : > { %725 = shalt.err (!%p722_p7)
}
  0x20   : > { %s726_s15 = scalar_lea.vmem %s210_s30, 256  ;;  %p734_p2 = scmp.lt.s32.totalorder %s210_s30, %s210_s30 }
  0x21   : > { %p727_p9 = scmp.ne.s32.totalorder %s210_s30, %s726_s15  ;;  %p735_p6 = scmp.lt.s32.totalorder %s726_s15, %s726_s15 }
  0x23   : > { %p729_p10 = pnand %p727_p9, %p715_p13  ;;  %p736_p4 = por %p735_p6, %p734_p2 }
  0x25   : > { %p730_p1 = pneg %p729_p10 }
  0x27   : > { %p737_p8 = pnand %p736_p4, %p730_p1 }
  0x29   : > { %740 = shalt.err (!%p737_p8)
}
  0x2a   : > { %s920_s16 = smov 64   ;;  %s921_s17 = smov 4  }
  0x2b   : > { %637 = dma.hbm_to_vmem [thread:$0]  (!%p1021_p11), %s1260_s1, 256, %s210_s30, [#allocation6], %s920_s16, %s920_s16, %s921_s17  }
  0x2c   : > { %p40_p1 = scmp.ge.s32.totalorder %s38_s7, 2  ;;  %s47_s9 = sadd.s32 1, %s905_s20 }
  0x2d   : > { %p54_p2 = scmp.ne.s32.totalorder %s905_s20, %s901_s19  ;;  %p55_p4 = scmp.eq.s32.totalorder %s917_s23, 0 }
  0x2e   : > { %s1290_s7 = smov (%p40_p1, %s38_s7), 0  ;;  %p1274_p8 = scmp.eq.s32.totalorder %s991_s24, 1 }
  0x2f   : > { %p1048_p6 = por %p55_p4, %p54_p2  ;;  %s42_s6 = ssub.s32 %s913_s22, %s1290_s7 }
  0x30   : > { %p1054_p10 = por %p1274_p8, %p54_p2  ;;  %p653_p12 = scmp.lt.s32.totalorder %s917_s23, 2 }
  0x31   : > { %p45_p11 = scmp.eq.s32.totalorder %s42_s6, 0  ;;  %s226_s30 = sand.u32 1, %s905_s20  }
  0x32   : > { %s589_s12 = sshll.u32 %s226_s30, 3  ;;  %s590_s14 = sshll.u32 %s913_s22, 7 }
  0x33   : > { %s1063_s13 = scalar_select %p45_p11, %s905_s20, %s47_s9  }
  0x34   : > { %s1069_s17 = scalar_lea.hbm %s1259_s0, %s590_s14  ;;  %s230_s29 = scalar_lea.vmem [#allocation2], %s589_s12 }
  0x35   : > { %s238_s8 = sshll.u32 %s230_s29, 4  ;;  %p1075_p13 = pnand %p653_p12, %p1048_p6  ;;  %s1071_s8 = int_to_ptr.vmem [resolvable:$true] %s238_s8 }
  0x36   : > { %s227_s9 = scalar_lea.sflag [#allocation3], %s226_s30  ;;  %s741_s25 = scalar_lea.hbm %s1069_s17, 128 }
  0x37   : > { %p742_p0 = scmp.ne.s32.totalorder %s1069_s17, %s741_s25  ;;  %p743_p3 = pneg %p1075_p13 }
  0x38   : > { %s746_s15 = scalar_lea.hbm %s1259_s0, 256  ;;  %p747_p9 = scmp.lt.u32.totalorder %s1069_s17, %s1259_s0 }
  0x39   : > { %p744_p5 = pnand %p743_p3, %p742_p0  ;;  %p748_p1 = scmp.lt.u32.totalorder %s746_s15, %s741_s25 }
  0x3a   : > { %p750_p4 = scmp.lt.u32.totalorder %s741_s25, %s1069_s17 }
  0x3b   : > { %p745_p7 = pneg %p744_p5  ;;  %p749_p2 = por %p748_p1, %p747_p9 }
  0x3d   : > { %p751_p6 = por %p750_p4, %p749_p2 }
  0x3f   : > { %p752_p8 = pnand %p751_p6, %p745_p7 }
  0x41   : > { %755 = shalt.err (!%p752_p8)
}
  0x42   : > { %s756_s30 = scalar_lea.vmem %s1071_s8, 128  ;;  %s922_s29 = smov [#allocation2]  }
  0x43   : > { %p757_p12 = scmp.ne.s32.totalorder %s1071_s8, %s756_s30  ;;  %s761_s12 = sshll.u32 %s922_s29, 4  ;;  %s762_s12 = int_to_ptr.vmem [resolvable:$false] %s761_s12 }
  0x44   : > { %s763_s14 = scalar_lea.vmem %s762_s12, 256  ;;  %p764_p5 = scmp.lt.s32.totalorder %s1071_s8, %s762_s12 }
  0x45   : > { %p759_p11 = pnand %p757_p12, %p743_p3  ;;  %p765_p9 = scmp.lt.s32.totalorder %s763_s14, %s756_s30 }
  0x47   : > { %p760_p0 = pneg %p759_p11  ;;  %p766_p1 = por %p765_p9, %p764_p5 }
  0x49   : > { %p767_p2 = pnand %p766_p1, %p760_p0 }
  0x4b   : > { %770 = shalt.err (!%p767_p2)
}
  0x4c   : > { %641 = dma.hbm_to_vmem [thread:$0]  (!%p1075_p13), %s1069_s17, 128, %s1071_s8, %s227_s9  }
  0x4d   : > { %p1277_p7 = scmp.ne.s32.totalorder %s1271_s28, 0 }
  0x4e   : > { %s1107_s25 = sand.u32 (!%p1277_p7), 1, %s901_s19   ;;  %p1278_p3 = scmp.ne.s32.totalorder (!%p1277_p7), %s1269_s26, 0 }
  0x4f   : > { %247 = sbr.rel (%p1277_p7) target bundleno = 467 (0x1d3), region = 32  ;;  %s592_s15 = sshll.u32 (!%p1277_p7), %s1107_s25, 3 }
  0x50   : > { %s250_s10 = scalar_lea.sflag (!%p1277_p7), [#allocation3], %s1107_s25  ;;  %s253_s16 = scalar_lea.vmem (!%p1277_p7), [#allocation2], %s592_s15 }
  0x56   : > { %880 = dma.done.wait (%p1278_p3), %s250_s10, 128  }
  0x57   : > { %882 = vsyncadd (%p1278_p3), %s250_s10, 4294967168  ;;  %p1279_p4 = scmp.eq.s32.totalorder %s991_s24, 0 }
  0x59   : > { %884 = dma.done.wait (%p1279_p4), [#allocation6], 256   ;;  %p1280_p13 = pmov %p1279_p4 }
  0x5a   : > { %v923_v0 = vmov 0.0   ;;  %vm924_vm0 = vmmov 0   ;;  %v711_v1 = vld [vmem:[#allocation5] sm:$0xff]   ;;  %v712_v2 = vld [vmem:[#allocation5 + $0x8] sm:$0xff]   ;;  %v295_v3 = vld [vmem:[%s253_s16] sm:$0xff]  ;;  %vm320_vm1 = vcmask 261120  }
  0x5b   : > { %886 = vsyncadd (%p1280_p13), [#allocation6], 4294967040  ;;  %614 = vmatprep.subr.bf16.mxu0 %v923_v0  ;;  %618 = vmatprep.mubr.msk.bf16.mxu0 %vm924_vm0, %v923_v0  ;;  %v296_v4 = vpack.c.bf16 %v295_v3, %v295_v3  ;;  %s1120_s26 = sshll.u32 %s1107_s25, 2  ;;  %v597_v5 = vld [vmem:[%s1261_s2] ss:$0 sm:$0xff]  ;;  %s1126_s8 = sshll.u32 %s909_s21, 6 }
  0x5c   : > { %615 = vmatpush3.bf16.msra.mxu0 %v711_v1  ;;  %s279_s6 = scalar_lea.vmem [#allocation7], %s1120_s26  ;;  %vm365_vm2 = vcmask 257024   ;;  %s1133_s12 = scalar_lea.hbm %s1262_s3, %s1126_s8 }
  0x5d   : > { %616 = vmatprep.subr.bf16.mxu0 %v923_v0  ;;  %s403_s9 = sshll.u32 %s279_s6, 4  ;;  %s925_s21 = smov 96   ;;  %s1135_s9 = int_to_ptr.vmem [resolvable:$true] %s403_s9 }
  0x5e   : > { %s379_s14 = scalar_lea.sflag [#allocation4], %s1107_s25  ;;  %s771_s15 = scalar_lea.vmem %s1135_s9, 64 }
  0x5f   : > { %p772_p6 = scmp.ne.s32.totalorder %s1135_s9, %s771_s15  ;;  %s926_s10 = smov [#allocation7]  }
  0x60   : > { %617 = vmatpush3.bf16.msra.mxu0 %v712_v2  ;;  %s775_s16 = sshll.u32 %s926_s10, 4  ;;  %s776_s16 = int_to_ptr.vmem [resolvable:$false] %s775_s16 }
  0x61   : > { %p773_p8 = pnand %p772_p6, %p1054_p10  ;;  %s777_s28 = scalar_lea.vmem %s776_s16, 128 }
  0x62   : > { %p778_p11 = scmp.lt.s32.totalorder %s1135_s9, %s776_s16  ;;  %p779_p0 = scmp.lt.s32.totalorder %s777_s28, %s771_s15 }
  0x63   : > { %619 = vmatmul.mubr.msk.bf16.vlgmr.msra.gmra.mrb[0].mxu0 %vm320_vm1, %v296_v4  ;;  %p774_p12 = pneg %p773_p8 }
  0x64   : > { %p780_p5 = por %p779_p0, %p778_p11 }
  0x66   : > { %p781_p9 = pnand %p780_p5, %p774_p12 }
 0x136   : > { %v358_v6 = vpop.f32.mrb[0].mxu0 }
 0x137   : > { %v359_v7 = vadd.f32 %v597_v5, %v358_v6  ;;  %v620_v8 = vpop.f32.mrb[1].mxu0 }
 0x138   : > { %v361_v9 = vpop.f32.mrb[2].mxu0 }
 0x139   : > { %v364_v10 = vpack.c.bf16 %v359_v7, %v359_v7  ;;  %v621_v11 = vpop.f32.mrb[3].mxu0 }
 0x13b   : > { %370 = vrot.lane.b32.xlu0 %v364_v10, %s925_s21  ;;  %366 = vst.msk [vmem:[%s279_s6] sm:$0xf] %vm365_vm2, %v364_v10 }
 0x13c   : > { %784 = shalt.err (!%p781_p9)
}
 0x13d   : > { %s785_s25 = scalar_lea.hbm %s1133_s12, 64  ;;  %s789_s30 = scalar_lea.hbm %s1262_s3, 128 }
 0x13e   : > { %p786_p1 = scmp.ne.s32.totalorder %s1133_s12, %s785_s25  ;;  %p790_p3 = scmp.lt.u32.totalorder %s1133_s12, %s1262_s3 }
 0x13f   : > { %p791_p4 = scmp.lt.u32.totalorder %s789_s30, %s785_s25  ;;  %p793_p6 = scmp.lt.u32.totalorder %s785_s25, %s1133_s12 }
 0x140   : > { %p787_p2 = pnand %p786_p1, %p1054_p10 }
 0x141   : > { %p792_p13 = por %p791_p4, %p790_p3 }
 0x142   : > { %p788_p7 = pneg %p787_p2 }
 0x143   : > { %p794_p8 = por %p793_p6, %p792_p13 }
 0x145   : > { %p795_p12 = pnand %p794_p8, %p788_p7 }
 0x147   : > { %798 = shalt.err (!%p795_p12)
}
 0x148   : > { %628 = dma.vmem_to_hbm [thread:$0]  (%p1054_p10), %s1135_s9, 64, %s1133_s12, %s379_s14  }
 0x149   : > { %s927_s15 = smov 64   ;;  %s383_s10 = sand.u32 1, %s991_s24  }
 0x14a   : > { %374 = vrot.lane.b32.xlu0 %v364_v10, %s927_s15  ;;  %s286_s16 = scalar_lea.vmem [#allocation8], %s1120_s26  ;;  %s1166_s6 = scalar_lea.hbm %s1263_s4, %s1126_s8 }
 0x14b   : > { %s417_s28 = sshll.u32 %s286_s16, 4  ;;  %s293_s30 = scalar_lea.vmem [#allocation10], %s1120_s26  ;;  %s1168_s28 = int_to_ptr.vmem [resolvable:$true] %s417_s28 }
 0x14c   : > { %s1173_s29 = sshll.u32 %s293_s30, 4  ;;  %s1176_s24 = scalar_lea.sflag [#allocation9], %s383_s10  ;;  %s1207_s29 = int_to_ptr.vmem [resolvable:$true] %s1173_s29 }
 0x14d   : > { %s799_s9 = scalar_lea.vmem %s1168_s28, 64  ;;  %s928_s12 = smov [#allocation8]  }
 0x14e   : > { %p800_p11 = scmp.ne.s32.totalorder %s1168_s28, %s799_s9  ;;  %s803_s14 = sshll.u32 %s928_s12, 4  ;;  %s804_s14 = int_to_ptr.vmem [resolvable:$false] %s803_s14 }
 0x14f   : > { %s805_s21 = scalar_lea.vmem %s804_s14, 128  ;;  %p806_p9 = scmp.lt.s32.totalorder %s1168_s28, %s804_s14 }
 0x150   : > { %p801_p0 = pnand %p800_p11, %p1054_p10  ;;  %p807_p1 = scmp.lt.s32.totalorder %s805_s21, %s799_s9 }
 0x152   : > { %p802_p5 = pneg %p801_p0  ;;  %p808_p2 = por %p807_p1, %p806_p9 }
 0x154   : > { %p809_p7 = pnand %p808_p2, %p802_p5 }
 0x1ad   : > { %v371_v12 = vpop.permute.xlu0 %370 }
 0x1ae   : > { %373 = vst.msk [vmem:[%s286_s16] sm:$0xf] %vm365_vm2, %v371_v12 }
 0x1af   : > { %812 = shalt.err (!%p809_p7)
}
 0x1b0   : > { %s813_s15 = scalar_lea.hbm %s1166_s6, 64  ;;  %s817_s25 = scalar_lea.hbm %s1263_s4, 128 }
 0x1b1   : > { %p814_p3 = scmp.ne.s32.totalorder %s1166_s6, %s813_s15  ;;  %p818_p6 = scmp.lt.u32.totalorder %s1166_s6, %s1263_s4 }
 0x1b2   : > { %p819_p8 = scmp.lt.u32.totalorder %s817_s25, %s813_s15  ;;  %p821_p11 = scmp.lt.u32.totalorder %s813_s15, %s1166_s6 }
 0x1b3   : > { %p815_p4 = pnand %p814_p3, %p1054_p10 }
 0x1b4   : > { %p820_p12 = por %p819_p8, %p818_p6 }
 0x1b5   : > { %p816_p13 = pneg %p815_p4 }
 0x1b6   : > { %p822_p0 = por %p821_p11, %p820_p12 }
 0x1b8   : > { %p823_p5 = pnand %p822_p0, %p816_p13 }
 0x1ba   : > { %826 = shalt.err (!%p823_p5)
}
 0x1bb   : > { %629 = dma.vmem_to_hbm [thread:$0]  (%p1054_p10), %s1168_s28, 64, %s1166_s6, %s1176_s24  }
 0x1bc   : > { %s1204_s21 = scalar_lea.hbm %s1264_s5, %s1126_s8  ;;  %v375_v13 = vpop.permute.xlu0 %374  ;;  %s827_s15 = scalar_lea.vmem %s1207_s29, 64 }
 0x1bd   : > { %377 = vst.msk [vmem:[%s293_s30] sm:$0xf] %vm365_vm2, %v375_v13  ;;  %p828_p9 = scmp.ne.s32.totalorder %s1207_s29, %s827_s15  ;;  %s929_s28 = smov [#allocation10]  }
 0x1be   : > { %s831_s6 = sshll.u32 %s929_s28, 4  ;;  %s832_s6 = int_to_ptr.vmem [resolvable:$false] %s831_s6 }
 0x1bf   : > { %p829_p1 = pnand %p828_p9, %p1054_p10  ;;  %s833_s10 = scalar_lea.vmem %s832_s6, 128 }
 0x1c0   : > { %p834_p7 = scmp.lt.s32.totalorder %s1207_s29, %s832_s6  ;;  %p835_p3 = scmp.lt.s32.totalorder %s833_s10, %s827_s15 }
 0x1c1   : > { %p830_p2 = pneg %p829_p1 }
 0x1c2   : > { %p836_p4 = por %p835_p3, %p834_p7 }
 0x1c4   : > { %p837_p13 = pnand %p836_p4, %p830_p2 }
 0x1c6   : > { %840 = shalt.err (!%p837_p13)
}
 0x1c7   : > { %s841_s26 = scalar_lea.hbm %s1204_s21, 64  ;;  %s845_s16 = scalar_lea.hbm %s1264_s5, 128 }
 0x1c8   : > { %p842_p6 = scmp.ne.s32.totalorder %s1204_s21, %s841_s26  ;;  %p846_p11 = scmp.lt.u32.totalorder %s1204_s21, %s1264_s5 }
 0x1c9   : > { %p847_p0 = scmp.lt.u32.totalorder %s845_s16, %s841_s26  ;;  %p849_p9 = scmp.lt.u32.totalorder %s841_s26, %s1204_s21 }
 0x1ca   : > { %p843_p8 = pnand %p842_p6, %p1054_p10 }
 0x1cb   : > { %p848_p5 = por %p847_p0, %p846_p11 }
 0x1cc   : > { %p844_p12 = pneg %p843_p8 }
 0x1cd   : > { %p850_p1 = por %p849_p9, %p848_p5 }
 0x1cf   : > { %p851_p2 = pnand %p850_p1, %p844_p12 }
 0x1d1   : > { %854 = shalt.err (!%p851_p2)
}
 0x1d2   : > { %630 = dma.vmem_to_hbm [thread:$0]  (%p1054_p10), %s1207_s29, 64, %s1204_s21, %s1176_s24  }
 0x1d3 PF: > { %s443_s12 = sand.u32 1, %s897_s18   ;;  %p1281_p7 = scmp.ne.s32.totalorder %s1270_s27, 0 }
 0x1d4   : > { %p1282_p3 = scmp.ge.s32.totalorder %s917_s23, 2  ;;  %s444_s9 = scalar_lea.sflag [#allocation4], %s443_s12 }
 0x1d6   : > { %p643_p4 = pnand %p1282_p3, %p1281_p7 }
 0x1d8   : > { %888 = dma.done.wait (!%p643_p4), %s444_s9, 64  }
 0x1d9   : > { %890 = vsyncadd (!%p643_p4), %s444_s9, 4294967232  ;;  %s1283_s14 = sadd.s32 4294967294, %s917_s23  }
 0x1da   : > { %s452_s15 = sand.u32 1, %s1283_s14  }
 0x1db   : > { %s453_s28 = scalar_lea.sflag [#allocation9], %s452_s15 }
 0x1dc   : > { %892 = dma.done.wait (!%p643_p4), %s453_s28, 128  }
 0x1dd   : > { %894 = vsyncadd (!%p643_p4), %s453_s28, 4294967168  ;;  %s26_s23 = sadd.s32 1, %s917_s23   ;;  %s1284_s18 = smov %s901_s19 }
 0x1de   : > { %p23_p10 = scmp.ge.s32.totalorder %s26_s23, 4   ;;  %s1285_s19 = smov %s905_s20 }
 0x1df   : > { %s1286_s20 = smov %s1063_s13  ;;  %s1287_s21 = smov %s913_s22 }
 0x1e0   : > { %s1288_s22 = smov %s1290_s7  ;;  %25 = sbr.rel (!%p23_p10) target bundleno = 9 (0x9), region = 113 }
 0x1e7   :  { %467 = vsyncpa [#allocation3], 1 }
 0x1e8   :  { %469 = vsyncpa [#allocation3 + $0x1], 1 }
 0x1e9   :  { %470 = vsyncpa [#allocation6], 1 }
 0x1ea   :  { %471 = vsyncpa [#allocation4], 1 }
 0x1eb   :  { %473 = vsyncpa [#allocation4 + $0x1], 1 }
 0x1ec   :  { %474 = vsyncpa [#allocation9], 1 }
 0x1ed   :  { %476 = vsyncpa [#allocation9 + $0x1], 1 }

</bundles_post_ra>
